<compile_context>
chip_gen: v7x
topology: tpu7x:2x2x1
jax: 0.10.0
libtpu: 0.0.40
codegen_flags: <defaults>
</compile_context>

<pallas_src>
import math

import jax
import jax.numpy as jnp
from jax.experimental import pallas as pl
from jax.experimental.pallas import tpu as pltpu

EPSILON = 1e-06

# Target number of elements per (TR, H, W) input tile.  256K f32 elements ->
# ~1 MiB per input array per buffer, ~4.6 MiB of double-buffered DMA VMEM
# (pred f32 + tgt f32 + mask i8 = 9 B/elem), comfortably inside the default
# scoped VMEM of v5e (16 MiB) and the 32 MiB limit requested below, while
# large enough to reach ~85% of HBM roofline.
_MAX_BLOCK_ELEMS = 256 * 1024
# TODO(synk): very large single images (H*W*9*2 > VMEM budget) would need
# H-tiling with a 2-row halo for the vertical gradient; not implemented.


def _grad_log_loss_kernel(pred_ref, tgt_ref, mask_ref, gacc_ref, macc_ref):
    # pred/tgt blocks: (TR, H, W) float32; mask block: (TR, H, W) int8 (0/1).
    # gacc/macc: per-core resident (1, 8, 128) f32 accumulator blocks.
    b = pl.program_id(1)  # inner ("arbitrary") axis index

    @pl.when(b == 0)
    def _init():
        gacc_ref[...] = jnp.zeros_like(gacc_ref)
        macc_ref[...] = jnp.zeros_like(macc_ref)

    valid = mask_ref[...] != 0
    m = valid.astype(jnp.float32)

    # Masked-out pixels never contribute (their pair masks are 0), so replace
    # them with 1.0 before the log to keep everything finite.
    pred = jnp.where(valid, pred_ref[...], jnp.float32(1.0))
    tgt = jnp.where(valid, tgt_ref[...], jnp.float32(1.0))
    diff = jnp.log(pred) - jnp.log(tgt)

    # vertical gradient: along H (2-pixel offset), masked
    v_grad = jnp.abs(diff[:, :-2, :] - diff[:, 2:, :])
    v_mask = m[:, :-2, :] * m[:, 2:, :]

    # horizontal gradient: along W (2-pixel offset), masked
    h_grad = jnp.abs(diff[:, :, :-2] - diff[:, :, 2:])
    h_mask = m[:, :, :-2] * m[:, :, 2:]

    g_blk = jnp.sum(h_grad * h_mask) + jnp.sum(v_grad * v_mask)
    m_blk = jnp.sum(h_mask) + jnp.sum(v_mask)

    # Broadcast-accumulate the per-block scalars into the resident per-core
    # accumulator blocks (every element of the block holds the same value;
    # the host reads [.., 0, 0]).
    gacc_ref[...] += g_blk
    macc_ref[...] += m_blk


def _largest_divisor_leq(n, cap):
    cap = max(1, min(n, cap))
    for d in range(cap, 0, -1):
        if n % d == 0:
            return d
    return 1


def _gradient_log_loss_pallas(pred, tgt, mask_i8):
    """pred/tgt: (R, H, W) f32, mask_i8: (R, H, W) int8. Returns scalar loss."""
    R, H, W = pred.shape

    # Split R across (up to) 2 TensorCores on v7x via a leading "parallel"
    # grid axis; single-TC chips (v5e/v6e) just run both slots sequentially.
    ncore = 2 if (R >= 2 and R % 2 == 0) else 1
    r_per_core = R // ncore
    tr = _largest_divisor_leq(r_per_core, max(1, _MAX_BLOCK_ELEMS // (H * W)))
    nb = r_per_core // tr

    def in_map(c, b):
        return (c * nb + b, 0, 0)

    def acc_map(c, b):
        return (c, 0, 0)

    gacc, macc = pl.pallas_call(
        _grad_log_loss_kernel,
        out_shape=(
            jax.ShapeDtypeStruct((ncore, 8, 128), jnp.float32),
            jax.ShapeDtypeStruct((ncore, 8, 128), jnp.float32),
        ),
        grid_spec=pltpu.PrefetchScalarGridSpec(
            num_scalar_prefetch=0,
            grid=(ncore, nb),
            in_specs=[
                pl.BlockSpec((tr, H, W), in_map),
                pl.BlockSpec((tr, H, W), in_map),
                pl.BlockSpec((tr, H, W), in_map),
            ],
            out_specs=[
                pl.BlockSpec((1, 8, 128), acc_map),
                pl.BlockSpec((1, 8, 128), acc_map),
            ],
        ),
        compiler_params=pltpu.CompilerParams(
            dimension_semantics=("parallel", "arbitrary"),
            vmem_limit_bytes=32 * 1024 * 1024,
        ),
    )(pred, tgt, mask_i8)

    grad_sum = jnp.sum(gacc[:, 0, 0])
    mask_sum = jnp.sum(macc[:, 0, 0])
    return grad_sum / (mask_sum + jnp.float32(EPSILON))


def gradient_loss_li_forward(prediction, target, mask,
                             scale_num=1, loss_weight=1.0):
    """JAX/Pallas equivalent of GradientLoss_Li.forward (inputs in NCHW)."""
    mask_i8 = mask.astype(jnp.int8)
    total = jnp.float32(0.0)
    for scale in range(scale_num):
        step = 2 ** scale
        # NOTE: mirrors the PyTorch module literally: `x[:, ::step, ::step]`
        # on an NCHW tensor strides the C and H dims.
        # TODO(synk): for scale_num > 1, fold the striding into the BlockSpec
        # index_map instead of materializing strided HBM copies per scale.
        p = prediction[:, ::step, ::step, :].astype(jnp.float32)
        t = target[:, ::step, ::step, :].astype(jnp.float32)
        m = mask_i8[:, ::step, ::step, :]
        B, C, H, W = p.shape
        total = total + _gradient_log_loss_pallas(
            p.reshape(B * C, H, W),
            t.reshape(B * C, H, W),
            m.reshape(B * C, H, W),
        )
    loss = total / jnp.float32(scale_num)
    return loss * jnp.float32(loss_weight)


def _reference_forward(prediction, target, mask, scale_num=1, loss_weight=1.0):
    """Pure-JAX mirror of the PyTorch module, for correctness checking."""
    mask_f = mask.astype(jnp.float32)
    target_trans = target + (1.0 - mask_f) * 100.0
    pred_log = jnp.log(prediction)
    gt_log = jnp.log(target_trans)
    total = 0.0
    for scale in range(scale_num):
        step = 2 ** scale
        pl_ = pred_log[:, ::step, ::step, :]
        gl_ = gt_log[:, ::step, ::step, :]
        m_ = mask_f[:, ::step, ::step, :]
        d = pl_ - gl_
        v_grad = jnp.abs(d[:, :, :-2, :] - d[:, :, 2:, :])
        v_mask = m_[:, :, :-2, :] * m_[:, :, 2:, :]
        v_grad = v_grad * v_mask
        h_grad = jnp.abs(d[:, :, :, :-2] - d[:, :, :, 2:])
        h_mask = m_[:, :, :, :-2] * m_[:, :, :, 2:]
        h_grad = h_grad * h_mask
        n = jnp.sum(h_mask) + jnp.sum(v_mask) + EPSILON
        total = total + (jnp.sum(h_grad) + jnp.sum(v_grad)) / n
    return (total / scale_num) * loss_weight


if __name__ == "__main__":
    key = jax.random.PRNGKey(0)
    k1, k2, k3 = jax.random.split(key, 3)
    B, C, H, W = 2, 4, 16, 16

    # positive prediction/target so log() is finite (as the loss expects)
    prediction = jax.random.uniform(k1, (B, C, H, W), jnp.float32, 0.5, 2.0)
    target = jax.random.uniform(k2, (B, C, H, W), jnp.float32, 0.5, 2.0)
    mask = jax.random.bernoulli(k3, 0.8, (B, C, H, W))  # bool, like torch mask

    loss = gradient_loss_li_forward(prediction, target, mask,
                                    scale_num=1, loss_weight=1.0)
    loss = jax.block_until_ready(loss)

    # nan/inf check (host-side, mirroring the torch .item() check)
    loss_val = float(loss)
    if math.isnan(loss_val) or math.isinf(loss_val):
        raise RuntimeError(f"VNL error, {loss_val}")

    ref = float(_reference_forward(prediction, target, mask))
    assert abs(loss_val - ref) <= 1e-5 * max(1.0, abs(ref)), (loss_val, ref)

    print("KERNEL_OK")
</pallas_src>

<mosaic_0001>
module attributes {stable_mosaic.version = 11 : i64} {
  func.func @_grad_log_loss_kernel(%arg0: i32, %arg1: i32, %arg2: memref<4x16x16xf32, #tpu.memory_space<vmem>>, %arg3: memref<4x16x16xf32, #tpu.memory_space<vmem>>, %arg4: memref<4x16x16xi8, #tpu.memory_space<vmem>>, %arg5: memref<1x8x128xf32, #tpu.memory_space<vmem>>, %arg6: memref<1x8x128xf32, #tpu.memory_space<vmem>>) attributes {dimension_semantics = [#tpu.dimension_semantics<parallel>, #tpu.dimension_semantics<arbitrary>], iteration_bounds = array<i64: 2, 1>, scalar_prefetch = 0 : i64, scratch_operands = 0 : i64, tpu.core_type = #tpu.core_type<tc>, window_params = [{transform_indices = @transform_0, window_bounds = array<i64: 4, 16, 16>}, {transform_indices = @transform_1, window_bounds = array<i64: 4, 16, 16>}, {transform_indices = @transform_2, window_bounds = array<i64: 4, 16, 16>}, {transform_indices = @transform_3, window_bounds = array<i64: 1, 8, 128>}, {transform_indices = @transform_4, window_bounds = array<i64: 1, 8, 128>}]} {
    %c0_i32 = arith.constant 0 : i32
    %0 = arith.cmpi eq, %arg1, %c0_i32 : i32
    %1 = arith.extui %0 : i1 to i32
    %c0_i32_0 = arith.constant 0 : i32
    %2 = arith.cmpi ne, %1, %c0_i32_0 : i32
    scf.if %2 {
      %cst_26 = arith.constant 0.000000e+00 : f32
      %59 = vector.broadcast %cst_26 : f32 to vector<1x8x128xf32>
      %c0_27 = arith.constant 0 : index
      %c0_28 = arith.constant 0 : index
      %c0_29 = arith.constant 0 : index
      %60 = vector.load %arg5[%c0_27, %c0_28, %c0_29] : memref<1x8x128xf32, #tpu.memory_space<vmem>>, vector<1x8x128xf32>
      tpu.vector_store %arg5[%c0_27, %c0_28, %c0_29], %59 {strides = array<i32>} : memref<1x8x128xf32, #tpu.memory_space<vmem>>, vector<1x8x128xf32>,
      %cst_30 = arith.constant 0.000000e+00 : f32
      %61 = vector.broadcast %cst_30 : f32 to vector<1x8x128xf32>
      %c0_31 = arith.constant 0 : index
      %c0_32 = arith.constant 0 : index
      %c0_33 = arith.constant 0 : index
      %62 = vector.load %arg6[%c0_31, %c0_32, %c0_33] : memref<1x8x128xf32, #tpu.memory_space<vmem>>, vector<1x8x128xf32>
      tpu.vector_store %arg6[%c0_31, %c0_32, %c0_33], %61 {strides = array<i32>} : memref<1x8x128xf32, #tpu.memory_space<vmem>>, vector<1x8x128xf32>,
    } else {
    }
    %c0 = arith.constant 0 : index
    %c0_1 = arith.constant 0 : index
    %c0_2 = arith.constant 0 : index
    %3 = vector.load %arg4[%c0, %c0_1, %c0_2] : memref<4x16x16xi8, #tpu.memory_space<vmem>>, vector<4x16x16xi8>
    %c0_i8 = arith.constant 0 : i8
    %4 = vector.broadcast %c0_i8 : i8 to vector<4x16x16xi8>
    %5 = arith.cmpi ne, %3, %4 : vector<4x16x16xi8>
    %6 = arith.extui %5 : vector<4x16x16xi1> to vector<4x16x16xi32>
    %7 = arith.sitofp %6 : vector<4x16x16xi32> to vector<4x16x16xf32>
    %c0_3 = arith.constant 0 : index
    %c0_4 = arith.constant 0 : index
    %c0_5 = arith.constant 0 : index
    %8 = vector.load %arg2[%c0_3, %c0_4, %c0_5] : memref<4x16x16xf32, #tpu.memory_space<vmem>>, vector<4x16x16xf32>
    %cst = arith.constant 1.000000e+00 : f32
    %9 = vector.broadcast %cst : f32 to vector<4x16x16xf32>
    %10 = arith.select %5, %8, %9 : vector<4x16x16xi1>, vector<4x16x16xf32>
    %c0_6 = arith.constant 0 : index
    %c0_7 = arith.constant 0 : index
    %c0_8 = arith.constant 0 : index
    %11 = vector.load %arg3[%c0_6, %c0_7, %c0_8] : memref<4x16x16xf32, #tpu.memory_space<vmem>>, vector<4x16x16xf32>
    %cst_9 = arith.constant 1.000000e+00 : f32
    %12 = vector.broadcast %cst_9 : f32 to vector<4x16x16xf32>
    %13 = arith.select %5, %11, %12 : vector<4x16x16xi1>, vector<4x16x16xf32>
    %14 = math.log %10 : vector<4x16x16xf32>
    %15 = math.log %13 : vector<4x16x16xf32>
    %16 = arith.subf %14, %15 : vector<4x16x16xf32>
    %17 = vector.extract_strided_slice %16 {offsets = [0, 0, 0], sizes = [4, 14, 16], strides = [1, 1, 1]} : vector<4x16x16xf32> to vector<4x14x16xf32>
    %18 = vector.extract_strided_slice %16 {offsets = [0, 2, 0], sizes = [4, 14, 16], strides = [1, 1, 1]} : vector<4x16x16xf32> to vector<4x14x16xf32>
    %19 = arith.subf %17, %18 : vector<4x14x16xf32>
    %20 = math.absf %19 : vector<4x14x16xf32>
    %21 = vector.extract_strided_slice %7 {offsets = [0, 0, 0], sizes = [4, 14, 16], strides = [1, 1, 1]} : vector<4x16x16xf32> to vector<4x14x16xf32>
    %22 = vector.extract_strided_slice %7 {offsets = [0, 2, 0], sizes = [4, 14, 16], strides = [1, 1, 1]} : vector<4x16x16xf32> to vector<4x14x16xf32>
    %23 = arith.mulf %21, %22 : vector<4x14x16xf32>
    %24 = vector.extract_strided_slice %16 {offsets = [0, 0, 0], sizes = [4, 16, 14], strides = [1, 1, 1]} : vector<4x16x16xf32> to vector<4x16x14xf32>
    %25 = vector.extract_strided_slice %16 {offsets = [0, 0, 2], sizes = [4, 16, 14], strides = [1, 1, 1]} : vector<4x16x16xf32> to vector<4x16x14xf32>
    %26 = arith.subf %24, %25 : vector<4x16x14xf32>
    %27 = math.absf %26 : vector<4x16x14xf32>
    %28 = vector.extract_strided_slice %7 {offsets = [0, 0, 0], sizes = [4, 16, 14], strides = [1, 1, 1]} : vector<4x16x16xf32> to vector<4x16x14xf32>
    %29 = vector.extract_strided_slice %7 {offsets = [0, 0, 2], sizes = [4, 16, 14], strides = [1, 1, 1]} : vector<4x16x16xf32> to vector<4x16x14xf32>
    %30 = arith.mulf %28, %29 : vector<4x16x14xf32>
    %31 = arith.mulf %27, %30 : vector<4x16x14xf32>
    %32 = vector.shape_cast %31 : vector<4x16x14xf32> to vector<1x4x16x14xf32>
    %cst_10 = arith.constant dense<0.000000e+00> : vector<1xf32>
    %33 = vector.multi_reduction <add>, %32, %cst_10 [1, 2, 3] : vector<1x4x16x14xf32> to vector<1xf32>
    %34 = vector.shape_cast %33 : vector<1xf32> to vector<1x1x1x1xf32>
    %35 = vector.extract %34[0, 0, 0, 0] : f32 from vector<1x1x1x1xf32>
    %36 = arith.mulf %20, %23 : vector<4x14x16xf32>
    %37 = vector.shape_cast %36 : vector<4x14x16xf32> to vector<1x4x14x16xf32>
    %cst_11 = arith.constant dense<0.000000e+00> : vector<1xf32>
    %38 = vector.multi_reduction <add>, %37, %cst_11 [1, 2, 3] : vector<1x4x14x16xf32> to vector<1xf32>
    %39 = vector.shape_cast %38 : vector<1xf32> to vector<1x1x1x1xf32>
    %40 = vector.extract %39[0, 0, 0, 0] : f32 from vector<1x1x1x1xf32>
    %41 = arith.addf %35, %40 : f32
    %42 = vector.shape_cast %30 : vector<4x16x14xf32> to vector<1x4x16x14xf32>
    %cst_12 = arith.constant dense<0.000000e+00> : vector<1xf32>
    %43 = vector.multi_reduction <add>, %42, %cst_12 [1, 2, 3] : vector<1x4x16x14xf32> to vector<1xf32>
    %44 = vector.shape_cast %43 : vector<1xf32> to vector<1x1x1x1xf32>
    %45 = vector.extract %44[0, 0, 0, 0] : f32 from vector<1x1x1x1xf32>
    %46 = vector.shape_cast %23 : vector<4x14x16xf32> to vector<1x4x14x16xf32>
    %cst_13 = arith.constant dense<0.000000e+00> : vector<1xf32>
    %47 = vector.multi_reduction <add>, %46, %cst_13 [1, 2, 3] : vector<1x4x14x16xf32> to vector<1xf32>
    %48 = vector.shape_cast %47 : vector<1xf32> to vector<1x1x1x1xf32>
    %49 = vector.extract %48[0, 0, 0, 0] : f32 from vector<1x1x1x1xf32>
    %50 = arith.addf %45, %49 : f32
    %c0_14 = arith.constant 0 : index
    %c0_15 = arith.constant 0 : index
    %c0_16 = arith.constant 0 : index
    %51 = vector.load %arg5[%c0_14, %c0_15, %c0_16] : memref<1x8x128xf32, #tpu.memory_space<vmem>>, vector<1x8x128xf32>
    %52 = vector.broadcast %41 : f32 to vector<1x8x128xf32>
    %53 = arith.addf %51, %52 : vector<1x8x128xf32>
    %c0_17 = arith.constant 0 : index
    %c0_18 = arith.constant 0 : index
    %c0_19 = arith.constant 0 : index
    %54 = vector.load %arg5[%c0_17, %c0_18, %c0_19] : memref<1x8x128xf32, #tpu.memory_space<vmem>>, vector<1x8x128xf32>
    tpu.vector_store %arg5[%c0_17, %c0_18, %c0_19], %53 {strides = array<i32>} : memref<1x8x128xf32, #tpu.memory_space<vmem>>, vector<1x8x128xf32>,
    %c0_20 = arith.constant 0 : index
    %c0_21 = arith.constant 0 : index
    %c0_22 = arith.constant 0 : index
    %55 = vector.load %arg6[%c0_20, %c0_21, %c0_22] : memref<1x8x128xf32, #tpu.memory_space<vmem>>, vector<1x8x128xf32>
    %56 = vector.broadcast %50 : f32 to vector<1x8x128xf32>
    %57 = arith.addf %55, %56 : vector<1x8x128xf32>
    %c0_23 = arith.constant 0 : index
    %c0_24 = arith.constant 0 : index
    %c0_25 = arith.constant 0 : index
    %58 = vector.load %arg6[%c0_23, %c0_24, %c0_25] : memref<1x8x128xf32, #tpu.memory_space<vmem>>, vector<1x8x128xf32>
    tpu.vector_store %arg6[%c0_23, %c0_24, %c0_25], %57 {strides = array<i32>} : memref<1x8x128xf32, #tpu.memory_space<vmem>>, vector<1x8x128xf32>,
    return
  }
  func.func @transform_0(%arg0: i32, %arg1: i32) -> (i32, i32, i32) {
    %c1_i32 = arith.constant 1 : i32
    %0 = arith.muli %arg0, %c1_i32 : i32
    %1 = arith.addi %0, %arg1 : i32
    %c0_i32 = arith.constant 0 : i32
    %c0_i32_0 = arith.constant 0 : i32
    %c0_i32_1 = arith.constant 0 : i32
    return %1, %c0_i32, %c0_i32_0 : i32, i32, i32
  }
  func.func @transform_1(%arg0: i32, %arg1: i32) -> (i32, i32, i32) {
    %c1_i32 = arith.constant 1 : i32
    %0 = arith.muli %arg0, %c1_i32 : i32
    %1 = arith.addi %0, %arg1 : i32
    %c0_i32 = arith.constant 0 : i32
    %c0_i32_0 = arith.constant 0 : i32
    %c0_i32_1 = arith.constant 0 : i32
    return %1, %c0_i32, %c0_i32_0 : i32, i32, i32
  }
  func.func @transform_2(%arg0: i32, %arg1: i32) -> (i32, i32, i32) {
    %c1_i32 = arith.constant 1 : i32
    %0 = arith.muli %arg0, %c1_i32 : i32
    %1 = arith.addi %0, %arg1 : i32
    %c0_i32 = arith.constant 0 : i32
    %c0_i32_0 = arith.constant 0 : i32
    %c0_i32_1 = arith.constant 0 : i32
    return %1, %c0_i32, %c0_i32_0 : i32, i32, i32
  }
  func.func @transform_3(%arg0: i32, %arg1: i32) -> (i32, i32, i32) {
    %c0_i32 = arith.constant 0 : i32
    %c0_i32_0 = arith.constant 0 : i32
    %c0_i32_1 = arith.constant 0 : i32
    return %arg0, %c0_i32, %c0_i32_0 : i32, i32, i32
  }
  func.func @transform_4(%arg0: i32, %arg1: i32) -> (i32, i32, i32) {
    %c0_i32 = arith.constant 0 : i32
    %c0_i32_0 = arith.constant 0 : i32
    %c0_i32_1 = arith.constant 0 : i32
    return %arg0, %c0_i32, %c0_i32_0 : i32, i32, i32
  }
}

</mosaic_0001>

<bundles_post_ra>
// kernel: tpu_custom_call.1
= control target key start
LH: loop header
LB: loop body
LE: loop exit
PB: predicated region body
PF: predicated region fallthrough
CT: control target
= control target key end

     0   :  { %s1964_s0 = inlined_call_operand.hbm [shape: f32[8,16,16], index: 0, kind: input, shape index: {}]   ;;  %s1965_s1 = inlined_call_operand.hbm [shape: f32[8,16,16], index: 1, kind: input, shape index: {}]   ;;  %s1966_s2 = inlined_call_operand.hbm [shape: s8[8,16,16], index: 2, kind: input, shape index: {}]   ;;  %s1967_s3 = inlined_call_operand.hbm [shape: f32[2,8,128], index: 3, kind: output, shape index: {0}]   ;;  %s1968_s4 = inlined_call_operand.hbm [shape: f32[2,8,128], index: 4, kind: output, shape index: {1}]  }
   0x1   :  { %1975 = sst [smem:[#allocation17_spill]] %s1964_s0 }
   0x2   :  { %1976 = sst [smem:[#allocation18_spill]] %s1965_s1 }
   0x3   :  { %10 = vsyncpa [#allocation3], 0 }
   0x4   :  { %12 = vsyncpa [#allocation3 + $0x1], 0 }
   0x5   :  { %13 = vsyncpa [#allocation6], 0 }
   0x6   :  { %15 = vsyncpa [#allocation6 + $0x1], 0 }
   0x7   :  { %16 = vsyncpa [#allocation4], 0 }
   0x8   :  { %18 = vsyncpa [#allocation4 + $0x1], 0 }
   0x9   :  { %19 = vsyncpa [#allocation10], 0 }
   0xa   :  { %21 = vsyncpa [#allocation10 + $0x1], 0  ;;  %s1364_s15 = smov 0   ;;  %s1366_s16 = smov 0  }
   0xb   :  { %s1368_s17 = smov 0   ;;  %s1370_s18 = smov 0  }
   0xc   :  { %s1372_s19 = smov 0   ;;  %s1374_s20 = smov 0  }
   0xd LB: > { %s1395_s21 = sadd.s32 4294967295, %s1325_s20   ;;  %s937_s22 = sadd.s32 4294967294, %s1325_s20   ;;  %s1325_s20 = sphi %s1374_s20, %s27_s20   ;;  %s1321_s19 = sphi %s1372_s19, %s2020_s19   ;;  %s1317_s18 = sphi %s1370_s18, %s2019_s18   ;;  %s1313_s17 = sphi %s1368_s17, %s2018_s17   ;;  %s1309_s16 = sphi %s1366_s16, %s2017_s16   ;;  %s1305_s15 = sphi %s1364_s15, %s2016_s15  }
   0xe   : > { %s39_s23 = sadd.s32 1, %s1321_s19  ;;  %s48_s24 = sadd.s32 1, %s1313_s17 }
   0xf   : > { %p41_p0 = scmp.ge.s32.totalorder %s39_s23, 2  ;;  %p55_p1 = scmp.ne.s32.totalorder %s1313_s17, %s1309_s16 }
  0x10   : > { %p56_p2 = scmp.eq.s32.totalorder %s1325_s20, 0  ;;  %p61_p3 = scmp.ne.s32.totalorder %s1309_s16, %s1305_s15 }
  0x11   : > { %s2022_s23 = smov (%p41_p0, %s39_s23), 0  ;;  %p62_p5 = scmp.eq.s32.totalorder %s1395_s21, 0 }
  0x12   : > { %1977 = sst [smem:[#allocation15_spill]] %s2022_s23  ;;  %p1407_p4 = por %p56_p2, %p55_p1 }
  0x13   : > { %s45_s26 = ssub.s32 %s1321_s19, %s2022_s23  ;;  %p141_p6 = scmp.eq.s32.totalorder %s1395_s21, 1 }
  0x14   : > { %p46_p7 = scmp.eq.s32.totalorder %s45_s26, 0  ;;  %p1415_p8 = por %p62_p5, %p61_p3 }
  0x15   : > { %p1419_p9 = por %p141_p6, %p55_p1  ;;  %p147_p10 = scmp.eq.s32.totalorder %s937_s22, 1 }
  0x16   : > { %s1979_s27 = scalar_select %p1415_p8, 1, 0 }
  0x17   : > { %s1980_s28 = scalar_select %p1419_p9, 1, 0 }
  0x18   : > { %s1424_s29 = scalar_select %p46_p7, %s1313_s17, %s48_s24  }
  0x19   : > { %p1426_p11 = por %p147_p10, %p61_p3  ;;  %p1013_p13 = scmp.lt.s32.totalorder %s1325_s20, 2 }
  0x1a   : > { %1981 = sst [smem:[#allocation16_spill]] %s1424_s29  ;;  %s1433_s5 = sand.u32 1, %s1313_s17  }
  0x1b   : > { %s1982_s30 = scalar_select %p1426_p11, 1, 0 }
  0x1c   : > { %s1969_s6 = sshll.u32 %s1433_s5, 6  ;;  %s973_s7 = sshll.u32 %s1321_s19, 10 }
  0x1d   : > { %p1439_p0 = pnand %p1013_p13, %p1407_p4  ;;  %s216_s9 = sand.u32 1, %s1325_s20  }
  0x1e   : > { %s1984_s1 = sld [smem:[#allocation18_spill]]  ;;  %s220_s13 = scalar_lea.vmem [#allocation5], %s1969_s6 }
  0x1f   : > { %s229_s14 = sshll.u32 %s220_s13, 4  ;;  %s1457_s22 = scalar_lea.sflag [#allocation6], %s216_s9  ;;  %s1454_s14 = int_to_ptr.vmem [resolvable:$true] %s229_s14 }
  0x20   : > { %p1463_p4 = pneg %p1439_p0 }
  0x24   : > { %s1449_s12 = scalar_lea.hbm %s1984_s1, %s973_s7  ;;  %s1122_s11 = scalar_lea.hbm %s1984_s1, 2048 }
  0x25   : > { %s1117_s24 = scalar_lea.hbm %s1449_s12, 1024  ;;  %p1123_p7 = scmp.lt.u32.totalorder %s1449_s12, %s1984_s1 }
  0x26   : > { %p1118_p3 = scmp.ne.s32.totalorder %s1449_s12, %s1117_s24  ;;  %p1124_p10 = scmp.lt.u32.totalorder %s1122_s11, %s1117_s24 }
  0x27   : > { %p1126_p12 = scmp.lt.u32.totalorder %s1117_s24, %s1449_s12 }
  0x28   : > { %p1120_p5 = pnand %p1463_p4, %p1118_p3  ;;  %p1125_p13 = por %p1124_p10, %p1123_p7 }
  0x2a   : > { %p1121_p6 = pneg %p1120_p5  ;;  %p1127_p1 = por %p1126_p12, %p1125_p13 }
  0x2c   : > { %p1128_p2 = pnand %p1127_p1, %p1121_p6 }
  0x2e   : > { %1131 = shalt.err (!%p1128_p2)
}
  0x2f   : > { %s1132_s9 = scalar_lea.vmem %s1454_s14, 1024  ;;  %s1327_s26 = smov [#allocation5]  }
  0x30   : > { %p1133_p3 = scmp.ne.s32.totalorder %s1454_s14, %s1132_s9  ;;  %s1137_s10 = sshll.u32 %s1327_s26, 4  ;;  %s1138_s10 = int_to_ptr.vmem [resolvable:$false] %s1137_s10 }
  0x31   : > { %s1139_s6 = scalar_lea.vmem %s1138_s10, 2048  ;;  %p1140_p9 = scmp.lt.s32.totalorder %s1454_s14, %s1138_s10 }
  0x32   : > { %p1135_p5 = pnand %p1133_p3, %p1463_p4  ;;  %p1141_p8 = scmp.lt.s32.totalorder %s1139_s6, %s1132_s9 }
  0x34   : > { %p1136_p11 = pneg %p1135_p5  ;;  %p1142_p7 = por %p1141_p8, %p1140_p9 }
  0x36   : > { %p1143_p10 = pnand %p1142_p7, %p1136_p11 }
  0x38   : > { %1146 = shalt.err (!%p1143_p10)
}
  0x39   : > { %s1973_s24 = smov 128   ;;  %s1974_s11 = smov 8  }
  0x3a   : > { %1002 = dma.hbm_to_vmem [thread:$0]  (!%p1439_p0), %s1449_s12, 1024, %s1454_s14, %s1457_s22, %s1973_s24, %s1973_s24, %s1974_s11  }
  0x3b   : > { %p1986_p8 = scmp.lt.s32.totalorder %s1325_s20, 3  ;;  %p1987_p9 = scmp.ge.s32.totalorder %s1325_s20, 1 }
  0x3c   : > { %s1989_s0 = sld [smem:[#allocation17_spill]]  ;;  %s1990_s6 = sshll.u32 %s1433_s5, 6 }
  0x3d   : > { %p1494_p11 = pnand %p1987_p9, %p1986_p8  ;;  %s197_s1 = scalar_lea.vmem [#allocation2], %s1990_s6 }
  0x3e   : > { %s206_s23 = sshll.u32 %s197_s1, 4  ;;  %s948_s12 = sshll.u32 %s1433_s5, 4  ;;  %s1508_s23 = int_to_ptr.vmem [resolvable:$true] %s206_s23 }
  0x3f   : > { %s1988_s13 = scalar_select %p1494_p11, 1, 0 }
  0x40   : > { %s194_s14 = scalar_lea.sflag [#allocation3], %s1433_s5 }
  0x42   : > { %s1503_s10 = scalar_lea.hbm %s1989_s0, %s973_s7  ;;  %s1152_s7 = scalar_lea.hbm %s1989_s0, 2048 }
  0x43   : > { %s1147_s24 = scalar_lea.hbm %s1503_s10, 1024  ;;  %p1153_p6 = scmp.lt.u32.totalorder %s1503_s10, %s1989_s0 }
  0x44   : > { %p1148_p12 = scmp.ne.s32.totalorder %s1503_s10, %s1147_s24  ;;  %p1154_p13 = scmp.lt.u32.totalorder %s1152_s7, %s1147_s24 }
  0x45   : > { %p1156_p5 = scmp.lt.u32.totalorder %s1147_s24, %s1503_s10 }
  0x46   : > { %p1150_p1 = pnand %p1148_p12, %p1463_p4  ;;  %p1155_p3 = por %p1154_p13, %p1153_p6 }
  0x48   : > { %p1151_p2 = pneg %p1150_p1  ;;  %p1157_p7 = por %p1156_p5, %p1155_p3 }
  0x4a   : > { %p1158_p10 = pnand %p1157_p7, %p1151_p2 }
  0x4c   : > { %1161 = shalt.err (!%p1158_p10)
}
  0x4d   : > { %s1162_s1 = scalar_lea.vmem %s1508_s23, 1024  ;;  %s1330_s11 = smov [#allocation2]  }
  0x4e   : > { %p1163_p8 = scmp.ne.s32.totalorder %s1508_s23, %s1162_s1  ;;  %s1167_s6 = sshll.u32 %s1330_s11, 4  ;;  %s1168_s6 = int_to_ptr.vmem [resolvable:$false] %s1167_s6 }
  0x4f   : > { %s1169_s29 = scalar_lea.vmem %s1168_s6, 2048  ;;  %p1170_p1 = scmp.lt.s32.totalorder %s1508_s23, %s1168_s6 }
  0x50   : > { %p1165_p9 = pnand %p1163_p8, %p1463_p4  ;;  %p1171_p11 = scmp.lt.s32.totalorder %s1169_s29, %s1162_s1 }
  0x52   : > { %p1166_p12 = pneg %p1165_p9  ;;  %p1172_p6 = por %p1171_p11, %p1170_p1 }
  0x54   : > { %p1173_p13 = pnand %p1172_p6, %p1166_p12 }
  0x56   : > { %1176 = shalt.err (!%p1173_p13)
}
  0x57   : > { %s1991_s24 = smov 8   ;;  %s1992_s9 = smov 128  }
  0x58   : > { %999 = dma.hbm_to_vmem [thread:$0]  (!%p1439_p0), %s1503_s10, 1024, %s1508_s23, %s194_s14, %s1992_s9, %s1992_s9, %s1991_s24  }
  0x59   : > { %s977_s7 = sshll.u32 %s1321_s19, 8  ;;  %s243_s26 = scalar_lea.vmem [#allocation7], %s948_s12 }
  0x5a   : > { %s252_s1 = sshll.u32 %s243_s26, 4  ;;  %s1543_s29 = scalar_lea.hbm %s1966_s2, %s977_s7  ;;  %s1545_s1 = int_to_ptr.vmem [resolvable:$true] %s252_s1 }
  0x5b   : > { %s1177_s0 = scalar_lea.hbm %s1543_s29, 256  ;;  %s1182_s10 = scalar_lea.hbm %s1966_s2, 512 }
  0x5c   : > { %p1178_p11 = scmp.ne.s32.totalorder %s1543_s29, %s1177_s0  ;;  %p1183_p5 = scmp.lt.u32.totalorder %s1543_s29, %s1966_s2 }
  0x5d   : > { %p1184_p7 = scmp.lt.u32.totalorder %s1182_s10, %s1177_s0  ;;  %p1186_p8 = scmp.lt.u32.totalorder %s1177_s0, %s1543_s29 }
  0x5e   : > { %p1180_p2 = pnand %p1178_p11, %p1463_p4 }
  0x5f   : > { %p1185_p10 = por %p1184_p7, %p1183_p5 }
  0x60   : > { %p1181_p3 = pneg %p1180_p2 }
  0x61   : > { %p1187_p9 = por %p1186_p8, %p1185_p10 }
  0x63   : > { %p1188_p12 = pnand %p1187_p9, %p1181_p3 }
  0x65   : > { %1191 = shalt.err (!%p1188_p12)
}
  0x66   : > { %s1192_s24 = scalar_lea.vmem %s1545_s1, 256  ;;  %s1331_s9 = smov [#allocation7]  }
  0x67   : > { %p1193_p1 = scmp.ne.s32.totalorder %s1545_s1, %s1192_s24  ;;  %s1197_s7 = sshll.u32 %s1331_s9, 4  ;;  %s1198_s7 = int_to_ptr.vmem [resolvable:$false] %s1197_s7 }
  0x68   : > { %s1199_s26 = scalar_lea.vmem %s1198_s7, 512  ;;  %p1200_p11 = scmp.lt.s32.totalorder %s1545_s1, %s1198_s7 }
  0x69   : > { %p1195_p6 = pnand %p1193_p1, %p1463_p4  ;;  %p1201_p2 = scmp.lt.s32.totalorder %s1199_s26, %s1192_s24 }
  0x6b   : > { %p1196_p13 = pneg %p1195_p6  ;;  %p1202_p5 = por %p1201_p2, %p1200_p11 }
  0x6d   : > { %p1203_p7 = pnand %p1202_p5, %p1196_p13 }
  0x6f   : > { %1206 = shalt.err (!%p1203_p7)
}
  0x70   : > { %s1332_s0 = smov 32   ;;  %s1333_s11 = smov 2  }
  0x71   : > { %1005 = dma.hbm_to_vmem [thread:$0]  (!%p1439_p0), %s1543_s29, 256, %s1545_s1, %s1457_s22, %s1332_s0, %s1332_s0, %s1333_s11  }
  0x72   : > { %p1993_p4 = scmp.ne.s32.totalorder %s1988_s13, 0 }
  0x73   : > { %s1572_s25 = sand.u32 (!%p1993_p4), 1, %s1309_s16   ;;  %p1994_p3 = scmp.ne.s32.totalorder (!%p1993_p4), %s1979_s27, 0 }
  0x74   : > { %264 = sbr.rel (%p1993_p4) target bundleno = 551 (0x227), region = 32  ;;  %s953_s6 = sshll.u32 (!%p1993_p4), %s1572_s25, 6 }
  0x75   : > { %s267_s23 = scalar_lea.sflag (!%p1993_p4), [#allocation3], %s1572_s25  ;;  %s1576_s5 = scalar_lea.vmem (!%p1993_p4), [#allocation2], %s953_s6 }
  0x7b   : > { %1288 = dma.done.wait (%p1994_p3), %s267_s23, 1024  }
  0x7c   : > { %1290 = vsyncadd (%p1994_p3), %s267_s23, 4294966272  ;;  %s275_s8 = sand.u32 1, %s1395_s21   ;;  %s1583_s13 = scalar_lea.vmem [#allocation5], %s953_s6 }
  0x7d   : > { %s276_s22 = scalar_lea.sflag [#allocation6], %s275_s8 }
  0x7e   : > { %1292 = dma.done.wait (%p1994_p3), %s276_s22, 1280  }
  0x7f   : > { %1294 = vsyncadd (%p1994_p3), %s276_s22, 4294966016  ;;  %s955_s1 = sshll.u32 %s1572_s25, 4  ;;  %v398_v2 = vld [vmem:[%s1576_s5] sm:$0xff]  ;;  %v399_v3 = vld [vmem:[%s1576_s5 + $0x8] sm:$0xff]  ;;  %vm478_vm2 = vcmask 1045504   ;;  %v1334_v4 = vmov 0  }
  0x80   : > { %s1590_s29 = scalar_lea.vmem [#allocation7], %s955_s1  ;;  %vm666_vm3 = vcmask 128000   ;;  %v414_v13 = vld [vmem:[%s1583_s13] sm:$0xff]  ;;  %v415_v14 = vld [vmem:[%s1583_s13 + $0x8] sm:$0xff]  ;;  %v1335_v20 = vmov 0.0   ;;  %s1336_s21 = smov 126  }
  0x81   : > { %v342_v0 = vld [vmem:[%s1590_s29] sm:$0x3]  ;;  %v343_v1 = vld [vmem:[%s1590_s29 + $0x2] sm:$0x3]  ;;  %v344_v7 = vld [vmem:[%s1590_s29 + $0x4] sm:$0x3] }
  0x82   : > { %vm350_vm0 = vnez %v342_v0  ;;  %vm351_vm1 = vnez %v343_v1  ;;  %v345_v10 = vld [vmem:[%s1590_s29 + $0x6] sm:$0x3]  ;;  %vm352_vm4 = vnez %v344_v7  ;;  %v346_v11 = vld [vmem:[%s1590_s29 + $0x8] sm:$0x3]  ;;  %v347_v12 = vld [vmem:[%s1590_s29 + $0xa] sm:$0x3] }
  0x83   : > { %v358_v5 = vsel %vm350_vm0, 16843009, %v1334_v4  ;;  %v359_v6 = vsel %vm351_vm1, 16843009, %v1334_v4  ;;  %vm353_vm5 = vnez %v345_v10  ;;  %v360_v15 = vsel %vm352_vm4, 16843009, %v1334_v4 }
  0x84   : > { %v366_v8 = vunpack.c.0.s8 %v358_v5  ;;  %v367_v9 = vunpack.c.0.s8 %v359_v6  ;;  %vm354_vm6 = vnez %v346_v11  ;;  %vm355_vm7 = vnez %v347_v12  ;;  %v402_v43 = vld [vmem:[%s1576_s5 + $0x20] sm:$0xff]  ;;  %v403_v46 = vld [vmem:[%s1576_s5 + $0x28] sm:$0xff]  ;;  %v400_v54 = vld [vmem:[%s1576_s5 + $0x10] sm:$0xff]  ;;  %s956_s27 = sshll.u32 %s1572_s25, 3  ;;  %s968_s12 = sshll.u32 %s1317_s18, 7 }
  0x85   : > { %v361_v18 = vsel %vm353_vm5, 16843009, %v1334_v4  ;;  %v368_v19 = vunpack.c.0.s8 %v360_v15  ;;  %v362_v33 = vsel %vm354_vm6, 16843009, %v1334_v4  ;;  %vm664_vm12 = vcmask 130048   ;;  %v418_v47 = vld [vmem:[%s1583_s13 + $0x20] sm:$0xff]  ;;  %s1882_s6 = scalar_lea.hbm %s1967_s3, %s968_s12  ;;  %s1892_s1 = scalar_lea.hbm %s1968_s4, %s968_s12 }
  0x86   : > { %vm1605_vm8 = vcmp.ne.s32.totalorder %v366_v8, 0  ;;  %vm1609_vm9 = vcmp.ne.s32.totalorder %v367_v9, 0  ;;  %v369_v30 = vunpack.c.0.s8 %v361_v18  ;;  %v363_v41 = vsel %vm355_vm7, 16843009, %v1334_v4  ;;  %v419_v50 = vld [vmem:[%s1583_s13 + $0x28] sm:$0xff]  ;;  %v416_v58 = vld [vmem:[%s1583_s13 + $0x10] sm:$0xff] }
  0x87   : > { %v1617_v21 = vsel %vm1605_vm8, 1.0, %v1335_v20  ;;  %v1622_v22 = vsel %vm1609_vm9, 1.0, %v1335_v20  ;;  %v406_v23 = vsel %vm1605_vm8, %v398_v2, 1.0  ;;  %v407_v24 = vsel %vm1609_vm9, %v399_v3, 1.0  ;;  %v401_v59 = vld [vmem:[%s1576_s5 + $0x18] sm:$0xff]  ;;  %v404_v17 = vld [vmem:[%s1576_s5 + $0x30] sm:$0xff] }
  0x88   : > { %v422_v25 = vsel %vm1605_vm8, %v414_v13, 1.0  ;;  %v423_v26 = vsel %vm1609_vm9, %v415_v14, 1.0  ;;  %1085 = vlog2.f32 %v406_v23  ;;  %v524_v27 = vrot.slane %v1622_v22, 2  ;;  %v417_v60 = vld [vmem:[%s1583_s13 + $0x18] sm:$0xff]  ;;  %v420_v18 = vld [vmem:[%s1583_s13 + $0x30] sm:$0xff]  ;;  %s320_s9 = scalar_lea.vmem [#allocation8], %s956_s27 }
  0x89   : > { %1087 = vlog2.f32 %v407_v24  ;;  %v1070_v28 = vpack.i.bf16 %v1622_v22, %v1617_v21  ;;  %v523_v29 = vrot.slane %v1617_v21, 2  ;;  %vm1639_vm10 = vcmp.ne.s32.totalorder %v368_v19, 0  ;;  %v348_v0 = vld [vmem:[%s1590_s29 + $0xc] sm:$0x3]  ;;  %v349_v5 = vld [vmem:[%s1590_s29 + $0xe] sm:$0x3] }
  0x8a   : > { %1089 = vlog2.f32 %v422_v25  ;;  %v1637_v31 = vmul.f32 %v1622_v22, %v524_v27  ;;  %vm1647_vm11 = vcmp.ne.s32.totalorder %v369_v30, 0  ;;  %v1654_v36 = vsel %vm1639_vm10, 1.0, %v1335_v20  ;;  %s767_s7 = sshll.u32 %s320_s9, 4  ;;  %s749_s29 = scalar_lea.sflag [#allocation4], %s1572_s25  ;;  %s1887_s7 = int_to_ptr.vmem [resolvable:$true] %s767_s7 }
  0x8b   : > { %1091 = vlog2.f32 %v423_v26  ;;  %1071 = vrot.lane.b32.xlu1 %v1070_v28, %s1336_s21  ;;  %v525_v34 = vsel %vm478_vm2, %v523_v29, %v524_v27  ;;  %v1664_v39 = vsel %vm1647_vm11, 1.0, %v1335_v20  ;;  %v370_v42 = vunpack.c.0.s8 %v362_v33  ;;  %v405_v26 = vld [vmem:[%s1576_s5 + $0x38] sm:$0xff]  ;;  %s1884_s5 = scalar_lea.vmem [#allocation9], %s956_s27  ;;  %p2011_p10 = scmp.ne.s32.totalorder %s1980_s28, 0 }
  0x8c   : > { %v716_v37 = vsel %vm666_vm3, %v1637_v31, 0.0  ;;  %v1659_v38 = vmul.f32 %v1617_v21, %v525_v34  ;;  %v1075_v40 = vpack.i.bf16 %v1664_v39, %v1654_v36  ;;  %v371_v45 = vunpack.c.0.s8 %v363_v41  ;;  %v421_v27 = vld [vmem:[%s1583_s13 + $0x38] sm:$0xff]  ;;  %s780_s8 = sshll.u32 %s1884_s5, 4  ;;  %s1337_s27 = smov [#allocation8]   ;;  %s1894_s8 = int_to_ptr.vmem [resolvable:$true] %s780_s8 }
  0x8d   : > { %vm1678_vm13 = vcmp.ne.s32.totalorder %v370_v42, 0  ;;  %v408_v3 = vsel %vm1639_vm10, %v400_v54, 1.0  ;;  %v424_v7 = vsel %vm1639_vm10, %v416_v58, 1.0  ;;  %v409_v8 = vsel %vm1647_vm11, %v401_v59, 1.0 }
  0x8e   : > { %v715_v44 = vsel %vm664_vm12, %v1659_v38, 0.0  ;;  %vm1683_vm14 = vcmp.ne.s32.totalorder %v371_v45, 0  ;;  %v1690_v52 = vsel %vm1678_vm13, 1.0, %v1335_v20  ;;  %v410_v53 = vsel %vm1678_vm13, %v402_v43, 1.0 }
  0x8f   : > { %v1675_v48 = vadd.f32 %v716_v37, %v715_v44  ;;  %1076 = vrot.lane.b32.xlu1 %v1075_v40, %s1336_s21  ;;  %v1698_v55 = vsel %vm1683_vm14, 1.0, %v1335_v20  ;;  %v411_v56 = vsel %vm1683_vm14, %v403_v46, 1.0  ;;  %v426_v57 = vsel %vm1678_vm13, %v418_v47, 1.0 }
  0x90   : > { %v427_v62 = vsel %vm1683_vm14, %v419_v50, 1.0  ;;  %1093 = vlog2.f32 %v410_v53  ;;  %v1080_v63 = vpack.i.bf16 %v1698_v55, %v1690_v52  ;;  %v425_v9 = vsel %vm1647_vm11, %v417_v60, 1.0 }
  0x91   : > { %1095 = vlog2.f32 %v411_v56  ;;  %vm356_vm15 = vnez %v348_v0  ;;  %vm357_vm0 = vnez %v349_v5  ;;  %v527_v40 = vrot.slane %v1664_v39, 2 }
  0x92   : > { %v1086_v61 = vpop.eup %1085  ;;  %1097 = vlog2.f32 %v426_v57  ;;  %1081 = vrot.lane.b32.xlu0 %v1080_v63, %s1336_s21  ;;  %v364_v14 = vsel %vm356_vm15, 16843009, %v1334_v4  ;;  %v365_v19 = vsel %vm357_vm0, 16843009, %v1334_v4  ;;  %v526_v41 = vrot.slane %v1654_v36, 2 }
  0x93   : > { %v1088_v1 = vpop.eup %1087  ;;  %v431_v2 = vmul.f32 0.6931472, %v1086_v61  ;;  %1099 = vlog2.f32 %v427_v62  ;;  %v372_v16 = vunpack.c.0.s8 %v364_v14  ;;  %v373_v23 = vunpack.c.0.s8 %v365_v19 }
  0x94   : > { %v1090_v6 = vpop.eup %1089  ;;  %v433_v12 = vmul.f32 0.6931472, %v1088_v1  ;;  %1101 = vlog2.f32 %v408_v3  ;;  %v528_v54 = vsel %vm478_vm2, %v526_v41, %v527_v40  ;;  %v530_v0 = vrot.slane %v1698_v55, 2 }
  0x95   : > { %v1092_v10 = vpop.eup %1091  ;;  %v447_v11 = vmul.f32 0.6931472, %v1090_v6  ;;  %1103 = vlog2.f32 %v424_v7  ;;  %vm1732_vm1 = vcmp.ne.s32.totalorder %v372_v16, 0  ;;  %vm1742_vm4 = vcmp.ne.s32.totalorder %v373_v23, 0 }
  0x96   : > { %v449_v13 = vmul.f32 0.6931472, %v1092_v10  ;;  %1105 = vlog2.f32 %v409_v8  ;;  %v412_v28 = vsel %vm1732_vm1, %v404_v17, 1.0  ;;  %v428_v4 = vsel %vm1732_vm1, %v420_v18, 1.0 }
  0x97   : > { %v1723_v15 = vsub.f32 %v431_v2, %v447_v11  ;;  %1107 = vlog2.f32 %v425_v9  ;;  %v413_v32 = vsel %vm1742_vm4, %v405_v26, 1.0  ;;  %v429_v33 = vsel %vm1742_vm4, %v421_v27, 1.0 }
  0x98   : > { %v1730_v24 = vsub.f32 %v433_v12, %v449_v13  ;;  %1109 = vlog2.f32 %v412_v28  ;;  %v1760_v58 = vsel %vm1732_vm1, 1.0, %v1335_v20  ;;  %v529_v1 = vrot.slane %v1690_v52, 2 }
  0x99   : > { %551 = vrot.lane.b32.xlu0 %v1723_v15, %s1336_s21  ;;  %1111 = vlog2.f32 %v428_v4  ;;  %v479_v43 = vrot.slane %v1723_v15, 2  ;;  %v532_v2 = vrot.slane %v1760_v58, 2  ;;  %v1771_v3 = vsel %vm1742_vm4, 1.0, %v1335_v20 }
  0x9a   : > { %v1094_v30 = vpop.eup %1093  ;;  %1113 = vlog2.f32 %v413_v32  ;;  %v480_v44 = vrot.slane %v1730_v24, 2  ;;  %v533_v13 = vrot.slane %v1771_v3, 2  ;;  %v531_v19 = vsel %vm478_vm2, %v529_v1, %v530_v0 }
  0x9b   : > { %v1096_v34 = vpop.eup %1095  ;;  %1115 = vlog2.f32 %v429_v33  ;;  %v439_v57 = vmul.f32 0.6931472, %v1094_v30  ;;  %v545_v25 = vmul.f32 %v1654_v36, %v528_v54  ;;  %v546_v28 = vmul.f32 %v1664_v39, %v527_v40 }
  0x9c   : > { %v1098_v35 = vpop.eup %1097  ;;  %v441_v50 = vmul.f32 0.6931472, %v1096_v34  ;;  %v481_v62 = vsel %vm478_vm2, %v479_v43, %v480_v44  ;;  %v500_v11 = vsub.f32 %v1730_v24, %v480_v44  ;;  %v534_v30 = vsel %vm478_vm2, %v532_v2, %v533_v13 }
  0x9d   : > { %553 = vrot.lane.b32.xlu0 %v1730_v24, %s1336_s21  ;;  %v1100_v37 = vpop.eup %1099  ;;  %v455_v61 = vmul.f32 0.6931472, %v1098_v35  ;;  %v499_v20 = vsub.f32 %v1723_v15, %v481_v62  ;;  %v547_v32 = vmul.f32 %v1690_v52, %v531_v19  ;;  %v718_v35 = vsel %vm664_vm12, %v545_v25, 0.0 }
  0x9e   : > { %v1102_v42 = vpop.eup %1101  ;;  %v457_v51 = vmul.f32 0.6931472, %v1100_v37  ;;  %v508_v4 = vand.u32 2147483647, %v500_v11  ;;  %v719_v40 = vadd.f32 %v718_v35, %v1675_v48  ;;  %v549_v43 = vmul.f32 %v1760_v58, %v534_v30 }
  0x9f   : > { %v1104_v45 = vpop.eup %1103  ;;  %v435_v46 = vmul.f32 0.6931472, %v1102_v42  ;;  %v1786_v17 = vsub.f32 %v439_v57, %v455_v61  ;;  %v507_v29 = vand.u32 2147483647, %v499_v20  ;;  %v548_v42 = vmul.f32 %v1698_v55, %v530_v0 }
  0xa0   : > { %v1106_v47 = vpop.eup %1105  ;;  %v451_v49 = vmul.f32 0.6931472, %v1104_v45  ;;  %v1776_v7 = vsub.f32 %v441_v50, %v457_v51  ;;  %v720_v44 = vsel %vm666_vm3, %v546_v28, 0.0  ;;  %v722_v45 = vsel %vm664_vm12, %v547_v32, 0.0 }
  0xa1   : > { %v1108_v53 = vpop.eup %1107  ;;  %v437_v56 = vmul.f32 0.6931472, %v1106_v47  ;;  %v485_v37 = vrot.slane %v1786_v17, 2  ;;  %v656_v47 = vmul.f32 %v1659_v38, %v507_v29  ;;  %v721_v50 = vadd.f32 %v720_v44, %v719_v40 }
  0xa2   : > { %v1762_v59 = vsub.f32 %v435_v46, %v451_v49  ;;  %v453_v60 = vmul.f32 0.6931472, %v1108_v53  ;;  %v1110_v63 = vpop.eup %1109  ;;  %v486_v41 = vrot.slane %v1776_v7, 2  ;;  %v550_v46 = vmul.f32 %v1771_v3, %v533_v13 }
  0xa3   : > { %v1112_v5 = vpop.eup %1111  ;;  %v443_v9 = vmul.f32 0.6931472, %v1110_v63  ;;  %v657_v49 = vmul.f32 %v1637_v31, %v508_v4  ;;  %v724_v53 = vsel %vm666_vm3, %v548_v42, 0.0  ;;  %v726_v54 = vsel %vm664_vm12, %v549_v43, 0.0 }
  0xa4   : > { %v482_v6 = vrot.slane %v1762_v59, 2  ;;  %555 = vrot.lane.b32.xlu1 %v1762_v59, %s1336_s21  ;;  %v1778_v8 = vsub.f32 %v437_v56, %v453_v60  ;;  %v1114_v10 = vpop.eup %1113  ;;  %v459_v12 = vmul.f32 0.6931472, %v1112_v5  ;;  %v487_v56 = vsel %vm478_vm2, %v485_v37, %v486_v41 }
  0xa5   : > { %v1116_v14 = vpop.eup %1115  ;;  %v445_v18 = vmul.f32 0.6931472, %v1114_v10  ;;  %v723_v57 = vadd.f32 %v722_v45, %v721_v50  ;;  %v728_v60 = vsel %vm666_vm3, %v550_v46, 0.0  ;;  %v667_v31 = vsel %vm666_vm3, %v657_v49, 0.0 }
  0xa6   : > { %v483_v16 = vrot.slane %v1778_v8, 2  ;;  %557 = vrot.lane.b32.xlu0 %v1778_v8, %s1336_s21  ;;  %v461_v23 = vmul.f32 0.6931472, %v1116_v14  ;;  %v1792_v26 = vsub.f32 %v443_v9, %v459_v12  ;;  %v503_v61 = vsub.f32 %v1786_v17, %v487_v56 }
  0xa7   : > { %v725_v38 = vadd.f32 %v724_v53, %v723_v57  ;;  %v665_v0 = vsel %vm664_vm12, %v656_v47, 0.0  ;;  %v504_v10 = vsub.f32 %v1776_v7, %v486_v41 }
  0xa8   : > { %561 = vrot.lane.b32.xlu1 %v1776_v7, %s1336_s21  ;;  %v484_v27 = vsel %vm478_vm2, %v482_v6, %v483_v16  ;;  %v1800_v33 = vsub.f32 %v445_v18, %v461_v23  ;;  %v502_v48 = vsub.f32 %v1778_v8, %v483_v16  ;;  %v488_v1 = vrot.slane %v1792_v26, 2 }
  0xa9   : > { %v501_v34 = vsub.f32 %v1762_v59, %v484_v27  ;;  %v727_v5 = vadd.f32 %v726_v54, %v725_v38  ;;  %v668_v6 = vadd.f32 %v667_v31, %v665_v0  ;;  %v511_v11 = vand.u32 2147483647, %v503_v61 }
  0xaa   : > { %559 = vrot.lane.b32.xlu0 %v1786_v17, %s1336_s21  ;;  %v510_v62 = vand.u32 2147483647, %v502_v48  ;;  %v489_v2 = vrot.slane %v1800_v33, 2  ;;  %v512_v18 = vand.u32 2147483647, %v504_v10 }
  0xab   : > { %v509_v51 = vand.u32 2147483647, %v501_v34  ;;  %v1832_v9 = vadd.f32 %v728_v60, %v727_v5  ;;  %v660_v19 = vmul.f32 %v547_v32, %v511_v11 }
  0xac   : > { %563 = vrot.lane.b32.xlu1 %v1792_v26, %s1336_s21  ;;  %v659_v12 = vmul.f32 %v546_v28, %v510_v62  ;;  %v490_v20 = vsel %vm478_vm2, %v488_v1, %v489_v2  ;;  %v506_v27 = vsub.f32 %v1800_v33, %v489_v2  ;;  %v661_v29 = vmul.f32 %v548_v42, %v512_v18 }
  0xad   : > { %v658_v63 = vmul.f32 %v545_v25, %v509_v51  ;;  %v505_v16 = vsub.f32 %v1792_v26, %v490_v20  ;;  %v673_v30 = vsel %vm664_vm12, %v660_v19, 0.0  ;;  %vm631_vm2 = vcmask 113664  }
  0xae   : > { %565 = vrot.lane.b32.xlu0 %v1800_v33, %s1336_s21  ;;  %v671_v23 = vsel %vm666_vm3, %v659_v12, 0.0  ;;  %v514_v28 = vand.u32 2147483647, %v506_v27  ;;  %v675_v37 = vsel %vm666_vm3, %v661_v29, 0.0 }
  0xaf   : > { %v669_v13 = vsel %vm664_vm12, %v658_v63, 0.0  ;;  %v513_v4 = vand.u32 2147483647, %v505_v16 }
  0xb0   : > { %603 = vrot.lane.b32.xlu1 %v1760_v58, %s1336_s21  ;;  %v670_v14 = vadd.f32 %v669_v13, %v668_v6  ;;  %v663_v40 = vmul.f32 %v550_v46, %v514_v28 }
  0xb1   : > { %v662_v35 = vmul.f32 %v549_v43, %v513_v4 }
  0xb2   : > { %605 = vrot.lane.b32.xlu0 %v1771_v3, %s1336_s21  ;;  %v672_v25 = vadd.f32 %v671_v23, %v670_v14  ;;  %v679_v32 = vsel %vm666_vm3, %v663_v40, 0.0  ;;  %s1207_s21 = scalar_lea.vmem %s1887_s7, 128 }
  0xb3   : > { %v677_v44 = vsel %vm664_vm12, %v662_v35, 0.0  ;;  %p1208_p0 = scmp.ne.s32.totalorder %s1887_s7, %s1207_s21 }
  0xb4   : > { %v674_v34 = vadd.f32 %v673_v30, %v672_v25 }
  0xb5   : > { %p1209_p8 = pnand %p1208_p0, %p2011_p10 }
  0xb6   : > { %v676_v41 = vadd.f32 %v675_v37, %v674_v34 }
  0xb7   : > { %p1210_p9 = pneg %p1209_p8 }
  0xb8   : > { %v678_v45 = vadd.f32 %v677_v44, %v676_v41 }
  0xba   : > { %v680_v47 = vadd.f32 %v679_v32, %v678_v45 }
  0xd1   : > { %681 = vadd.xlane.f32.xlu0 %v680_v47 }
  0xfd   : > { %v1072_v49 = vpop.permute.xlu1 %1071 }
  0xfe   : > { %v1074_v48 = vunpack.i.h.bf16 %v1072_v49  ;;  %v1073_v42 = vunpack.i.l.bf16 %v1072_v49 }
 0x100   : > { %v616_v54 = vmul.f32 %v1074_v48, %v1622_v22  ;;  %v615_v43 = vmul.f32 %v1073_v42, %v1617_v21 }
 0x101   : > { %v1077_v53 = vpop.permute.xlu1 %1076 }
 0x102   : > { %v1078_v56 = vunpack.i.l.bf16 %v1077_v53  ;;  %v692_v31 = vsel %vm631_vm2, %v616_v54, 0.0  ;;  %v691_v61 = vsel %vm631_vm2, %v615_v43, 0.0  ;;  %v1079_v62 = vunpack.i.h.bf16 %v1077_v53 }
 0x103   : > { %v693_v22 = vadd.f32 %v692_v31, %v691_v61 }
 0x104   : > { %v1082_v50 = vpop.permute.xlu0 %1081  ;;  %v617_v63 = vmul.f32 %v1078_v56, %v1654_v36  ;;  %v618_v21 = vmul.f32 %v1079_v62, %v1664_v39 }
 0x105   : > { %v1083_v2 = vunpack.i.l.bf16 %v1082_v50  ;;  %v1084_v12 = vunpack.i.h.bf16 %v1082_v50 }
 0x106   : > { %v694_v5 = vsel %vm631_vm2, %v617_v63, 0.0  ;;  %v696_v36 = vsel %vm631_vm2, %v618_v21, 0.0 }
 0x107   : > { %v695_v11 = vadd.f32 %v694_v5, %v693_v22  ;;  %v619_v13 = vmul.f32 %v1083_v2, %v1690_v52  ;;  %v620_v4 = vmul.f32 %v1084_v12, %v1698_v55 }
 0x109   : > { %v697_v27 = vadd.f32 %v696_v36, %v695_v11  ;;  %v698_v29 = vsel %vm631_vm2, %v619_v13, 0.0  ;;  %v700_v55 = vsel %vm631_vm2, %v620_v4, 0.0 }
 0x10b   : > { %v552_v51 = vpop.permute.xlu0 %551  ;;  %v699_v44 = vadd.f32 %v698_v29, %v697_v27 }
 0x10c   : > { %v575_v46 = vsub.f32 %v1723_v15, %v552_v51 }
 0x10e   : > { %v583_v0 = vand.u32 2147483647, %v575_v46 }
 0x10f   : > { %v554_v57 = vpop.permute.xlu0 %553 }
 0x110   : > { %v576_v60 = vsub.f32 %v1730_v24, %v554_v57  ;;  %v623_v15 = vmul.f32 %v615_v43, %v583_v0  ;;  %v701_v43 = vadd.f32 %v700_v55, %v699_v44 }
 0x112   : > { %v584_v38 = vand.u32 2147483647, %v576_v60  ;;  %v632_v14 = vsel %vm631_vm2, %v623_v15, 0.0 }
 0x114   : > { %v624_v1 = vmul.f32 %v616_v54, %v584_v38 }
 0x116   : > { %v556_v6 = vpop.permute.xlu1 %555  ;;  %v633_v10 = vsel %vm631_vm2, %v624_v1, 0.0 }
 0x117   : > { %v577_v24 = vsub.f32 %v1762_v59, %v556_v6  ;;  %v634_v18 = vadd.f32 %v633_v10, %v632_v14 }
 0x118   : > { %v558_v20 = vpop.permute.xlu0 %557 }
 0x119   : > { %v585_v16 = vand.u32 2147483647, %v577_v24  ;;  %v578_v39 = vsub.f32 %v1778_v8, %v558_v20 }
 0x11a   : > { %v562_v19 = vpop.permute.xlu1 %561 }
 0x11b   : > { %v625_v23 = vmul.f32 %v617_v63, %v585_v16  ;;  %v580_v25 = vsub.f32 %v1776_v7, %v562_v19  ;;  %v586_v59 = vand.u32 2147483647, %v578_v39 }
 0x11c   : > { %v560_v52 = vpop.permute.xlu0 %559 }
 0x11d   : > { %v635_v30 = vsel %vm631_vm2, %v625_v23, 0.0  ;;  %v588_v34 = vand.u32 2147483647, %v580_v25  ;;  %v626_v28 = vmul.f32 %v618_v21, %v586_v59  ;;  %v579_v35 = vsub.f32 %v1786_v17, %v560_v52 }
 0x11e   : > { %v636_v37 = vadd.f32 %v635_v30, %v634_v18  ;;  %v564_v8 = vpop.permute.xlu1 %563 }
 0x11f   : > { %v637_v41 = vsel %vm631_vm2, %v626_v28, 0.0  ;;  %v581_v40 = vsub.f32 %v1792_v26, %v564_v8  ;;  %v587_v7 = vand.u32 2147483647, %v579_v35  ;;  %v628_v45 = vmul.f32 %v620_v4, %v588_v34 }
 0x120   : > { %v566_v32 = vpop.permute.xlu0 %565  ;;  %v638_v48 = vadd.f32 %v637_v41, %v636_v37 }
 0x121   : > { %v589_v47 = vand.u32 2147483647, %v581_v40  ;;  %v627_v49 = vmul.f32 %v619_v13, %v587_v7  ;;  %v582_v50 = vsub.f32 %v1800_v33, %v566_v32  ;;  %v641_v53 = vsel %vm631_vm2, %v628_v45, 0.0 }
 0x122   : > { %v604_v42 = vpop.permute.xlu1 %603 }
 0x123   : > { %v639_v17 = vsel %vm631_vm2, %v627_v49, 0.0  ;;  %v621_v51 = vmul.f32 %v1760_v58, %v604_v42  ;;  %v590_v57 = vand.u32 2147483647, %v582_v50 }
 0x124   : > { %v640_v54 = vadd.f32 %v639_v17, %v638_v48  ;;  %v606_v26 = vpop.permute.xlu0 %605 }
 0x125   : > { %v629_v56 = vmul.f32 %v621_v51, %v589_v47  ;;  %v702_v46 = vsel %vm631_vm2, %v621_v51, 0.0  ;;  %v622_v60 = vmul.f32 %v1771_v3, %v606_v26 }
 0x126   : > { %v703_v31 = vadd.f32 %v702_v46, %v701_v43  ;;  %v642_v38 = vadd.f32 %v641_v53, %v640_v54 }
 0x127   : > { %v630_v33 = vmul.f32 %v622_v60, %v590_v57  ;;  %v704_v61 = vsel %vm631_vm2, %v622_v60, 0.0  ;;  %v643_v62 = vsel %vm631_vm2, %v629_v56, 0.0 }
 0x128   : > { %v705_v63 = vadd.f32 %v704_v61, %v703_v31  ;;  %v644_v58 = vadd.f32 %v643_v62, %v642_v38 }
 0x129   : > { %v645_v0 = vsel %vm631_vm2, %v630_v33, 0.0 }
 0x12a   : > { %706 = vadd.xlane.f32.xlu0 %v705_v63  ;;  %v646_v1 = vadd.f32 %v645_v0, %v644_v58 }
 0x12c   : > { %647 = vadd.xlane.f32.xlu1 %v646_v1 }
 0x130   : > { %730 = vadd.xlane.f32.xlu1 %v1832_v9 }
 0x15e   : > { %v682_v22 = vpop.xlane.xlu0 %681 }
 0x15f   : > { %v683_v2 = vrot.slane %v682_v22, 4 }
 0x161   : > { %v684_v21 = vadd.f32 %v683_v2, %v682_v22 }
 0x163   : > { %v685_v15 = vrot.slane %v684_v21, 2 }
 0x165   : > { %v686_v20 = vadd.f32 %v685_v15, %v684_v21 }
 0x167   : > { %v687_v9 = vrot.slane %v686_v20, 1 }
 0x169   : > { %v688_v4 = vadd.f32 %v687_v9, %v686_v20 }
 0x1b7   : > { %v707_v3 = vpop.xlane.xlu0 %706 }
 0x1b8   : > { %v708_v5 = vrot.slane %v707_v3, 4 }
 0x1b9   : > { %v648_v6 = vpop.xlane.xlu1 %647 }
 0x1ba   : > { %v709_v24 = vadd.f32 %v708_v5, %v707_v3  ;;  %v649_v10 = vrot.slane %v648_v6, 4 }
 0x1bc   : > { %v710_v11 = vrot.slane %v709_v24, 2  ;;  %v650_v12 = vadd.f32 %v649_v10, %v648_v6 }
 0x1bd   : > { %v731_v13 = vpop.xlane.xlu1 %730 }
 0x1be   : > { %v711_v36 = vadd.f32 %v710_v11, %v709_v24  ;;  %v651_v14 = vrot.slane %v650_v12, 2  ;;  %v732_v16 = vrot.slane %v731_v13, 4 }
 0x1c0   : > { %v733_v39 = vadd.f32 %v732_v16, %v731_v13  ;;  %v652_v18 = vadd.f32 %v651_v14, %v650_v12  ;;  %v712_v25 = vrot.slane %v711_v36, 1 }
 0x1c2   : > { %v734_v19 = vrot.slane %v733_v39, 2  ;;  %v653_v23 = vrot.slane %v652_v18, 1  ;;  %v713_v29 = vadd.f32 %v712_v25, %v711_v36 }
 0x1c4   : > { %v735_v59 = vadd.f32 %v734_v19, %v733_v39  ;;  %v654_v27 = vadd.f32 %v653_v23, %v652_v18 }
 0x1c6   : > { %978 = vpush %v654_v27  ;;  %v736_v52 = vrot.slane %v735_v59, 1 }
 0x1c7   : > { %980 = vpush %v688_v4 }
 0x1c8   : > { %982 = vpush %v713_v29  ;;  %v737_v30 = vadd.f32 %v736_v52, %v735_v59 }
 0x1ca   : > { %984 = vpush %v737_v30 }
 0x1f7   : > { %s979_s10 = spop %978 }
 0x1f8   : > { %s981_s14 = spop %980 }
 0x1f9   : > { %s690_s24 = sadd.f32 %s981_s14, %s979_s10  ;;  %s983_s26 = spop %982 }
 0x1fa   : > { %s1211_s10 = sshll.u32 %s1337_s27, 4  ;;  %s1212_s10 = int_to_ptr.vmem [resolvable:$false] %s1211_s10 }
 0x1fb   : > { %v741_v34 = vstv %s690_s24  ;;  %s985_s23 = spop %984  ;;  %s1213_s14 = scalar_lea.vmem %s1212_s10, 256 }
 0x1fc   : > { %s739_s22 = sadd.f32 %s985_s23, %s983_s26  ;;  %743 = vst [vmem:[%s320_s9] sm:$0xff] %v741_v34  ;;  %p1214_p12 = scmp.lt.s32.totalorder %s1887_s7, %s1212_s10 }
 0x1fd   : > { %p1215_p1 = scmp.lt.s32.totalorder %s1213_s14, %s1207_s21 }
 0x1fe   : > { %v745_v28 = vstv %s739_s22 }
 0x1ff   : > { %p1216_p6 = por %p1215_p1, %p1214_p12 }
 0x201   : > { %p1217_p13 = pnand %p1216_p6, %p1210_p9 }
 0x203   : > { %1220 = shalt.err (!%p1217_p13)
}
 0x204   : > { %s1221_s12 = scalar_lea.hbm %s1882_s6, 128  ;;  %s1225_s26 = scalar_lea.hbm %s1967_s3, 256 }
 0x205   : > { %p1222_p11 = scmp.ne.s32.totalorder %s1882_s6, %s1221_s12  ;;  %p1226_p7 = scmp.lt.u32.totalorder %s1882_s6, %s1967_s3 }
 0x206   : > { %p1227_p4 = scmp.lt.u32.totalorder %s1225_s26, %s1221_s12  ;;  %p1229_p0 = scmp.lt.u32.totalorder %s1221_s12, %s1882_s6 }
 0x207   : > { %p1223_p2 = pnand %p1222_p11, %p2011_p10 }
 0x208   : > { %p1228_p3 = por %p1227_p4, %p1226_p7 }
 0x209   : > { %p1224_p5 = pneg %p1223_p2 }
 0x20a   : > { %p1230_p8 = por %p1229_p0, %p1228_p3 }
 0x20c   : > { %p1231_p9 = pnand %p1230_p8, %p1224_p5 }
 0x20e   : > { %1234 = shalt.err (!%p1231_p9)
}
 0x20f   : > { %992 = dma.vmem_to_hbm [thread:$0]  (%p2011_p10), %s1887_s7, 128, %s1882_s6, %s749_s29   ;;  %747 = vst [vmem:[%s1884_s5] sm:$0xff] %v745_v28 }
 0x210   : > { %s754_s23 = scalar_lea.sflag [#allocation10], %s1572_s25  ;;  %s1235_s22 = scalar_lea.vmem %s1894_s8, 128 }
 0x211   : > { %p1236_p12 = scmp.ne.s32.totalorder %s1894_s8, %s1235_s22  ;;  %s1338_s18 = smov [#allocation9]  }
 0x212   : > { %s1239_s13 = sshll.u32 %s1338_s18, 4  ;;  %s1240_s13 = int_to_ptr.vmem [resolvable:$false] %s1239_s13 }
 0x213   : > { %p1237_p1 = pnand %p1236_p12, %p2011_p10  ;;  %s1241_s21 = scalar_lea.vmem %s1240_s13, 256 }
 0x214   : > { %p1242_p13 = scmp.lt.s32.totalorder %s1894_s8, %s1240_s13  ;;  %p1243_p11 = scmp.lt.s32.totalorder %s1241_s21, %s1235_s22 }
 0x215   : > { %p1238_p6 = pneg %p1237_p1 }
 0x216   : > { %p1244_p2 = por %p1243_p11, %p1242_p13 }
 0x218   : > { %p1245_p5 = pnand %p1244_p2, %p1238_p6 }
 0x21a   : > { %1248 = shalt.err (!%p1245_p5)
}
 0x21b   : > { %s1249_s25 = scalar_lea.hbm %s1892_s1, 128  ;;  %s1253_s5 = scalar_lea.hbm %s1968_s4, 256 }
 0x21c   : > { %p1250_p7 = scmp.ne.s32.totalorder %s1892_s1, %s1249_s25  ;;  %p1254_p0 = scmp.lt.u32.totalorder %s1892_s1, %s1968_s4 }
 0x21d   : > { %p1255_p8 = scmp.lt.u32.totalorder %s1253_s5, %s1249_s25  ;;  %p1257_p12 = scmp.lt.u32.totalorder %s1249_s25, %s1892_s1 }
 0x21e   : > { %p1251_p4 = pnand %p1250_p7, %p2011_p10 }
 0x21f   : > { %p1256_p9 = por %p1255_p8, %p1254_p0 }
 0x220   : > { %p1252_p3 = pneg %p1251_p4 }
 0x221   : > { %p1258_p1 = por %p1257_p12, %p1256_p9 }
 0x223   : > { %p1259_p6 = pnand %p1258_p1, %p1252_p3 }
 0x225   : > { %1262 = shalt.err (!%p1259_p6)
}
 0x226   : > { %993 = dma.vmem_to_hbm [thread:$0]  (%p2011_p10), %s1894_s8, 128, %s1892_s1, %s754_s23  }
 0x227 PF: > { %s792_s10 = sand.u32 1, %s1305_s15   ;;  %p2012_p13 = scmp.ne.s32.totalorder %s1982_s30, 0 }
 0x228   : > { %p2013_p11 = scmp.ge.s32.totalorder %s1325_s20, 2  ;;  %s793_s14 = scalar_lea.sflag [#allocation4], %s792_s10 }
 0x22a   : > { %p1007_p2 = pnand %p2013_p11, %p2012_p13 }
 0x22c   : > { %1296 = dma.done.wait (!%p1007_p2), %s793_s14, 128  }
 0x22d   : > { %1298 = vsyncadd (!%p1007_p2), %s793_s14, 4294967168  ;;  %s802_s12 = scalar_lea.sflag [#allocation10], %s792_s10 }
 0x22e   : > { %1300 = dma.done.wait (!%p1007_p2), %s802_s12, 128  }
 0x22f   : > { %1302 = vsyncadd (!%p1007_p2), %s802_s12, 4294967168  ;;  %s27_s20 = sadd.s32 1, %s1325_s20   ;;  %s2014_s28 = sld [smem:[#allocation16_spill]] }
 0x230   : > { %p24_p5 = scmp.ge.s32.totalorder %s27_s20, 4   ;;  %s2015_s8 = sld [smem:[#allocation15_spill]] }
 0x231   : > { %s2016_s15 = smov %s1309_s16  ;;  %s2017_s16 = smov %s1313_s17 }
 0x232   : > { %s2019_s18 = smov %s1321_s19  ;;  %26 = sbr.rel (!%p24_p5) target bundleno = 13 (0xd), region = 122 }
 0x235   : > { %s2018_s17 = smov %s2014_s28 }
 0x236   : > { %s2020_s19 = smov %s2015_s8 }
 0x239   :  { %807 = vsyncpa [#allocation3], 1 }
 0x23a   :  { %809 = vsyncpa [#allocation3 + $0x1], 1 }
 0x23b   :  { %810 = vsyncpa [#allocation6], 1 }
 0x23c   :  { %812 = vsyncpa [#allocation6 + $0x1], 1 }
 0x23d   :  { %813 = vsyncpa [#allocation4], 1 }
 0x23e   :  { %815 = vsyncpa [#allocation4 + $0x1], 1 }
 0x23f   :  { %816 = vsyncpa [#allocation10], 1 }
 0x240   :  { %818 = vsyncpa [#allocation10 + $0x1], 1 }

</bundles_post_ra>
